<compile_context>
chip_gen: v7x
topology: tpu7x:2x2x1
jax: 0.10.0
libtpu: 0.0.40
codegen_flags: <defaults>
</compile_context>

<pallas_src>
import jax
import jax.numpy as jnp
from jax.experimental import pallas as pl
from jax.experimental.pallas import tpu as pltpu


def _round_up(x, m):
    return ((x + m - 1) // m) * m


def _ffn_kernel(x_ref, w1_ref, b1_ref, w2_ref, b2_ref, o_ref, acc_ref):
    """One (tm, dim) token tile x one hid slice, accumulated over hid slices."""
    h_idx = pl.program_id(1)

    @pl.when(h_idx == 0)
    def _init():
        acc_ref[...] = jnp.zeros_like(acc_ref)

    # fc1 for this hid slice: bf16 x bf16 -> f32 accumulation on the MXU.
    h = jnp.dot(x_ref[...], w1_ref[...], preferred_element_type=jnp.float32)
    h = jnp.maximum(h + b1_ref[...], 0.0)      # bias + ReLU in f32
    # TODO(synk): nn.Dropout is identity in eval mode; training-mode dropout
    # would use pltpu.prng_seed / pltpu.prng_random_bits here.

    # fc2 partial product for this hid slice, accumulated in f32.
    acc_ref[...] += jnp.dot(h.astype(w2_ref.dtype), w2_ref[...],
                            preferred_element_type=jnp.float32)

    @pl.when(h_idx == pl.num_programs(1) - 1)
    def _finalize():
        o_ref[...] = (acc_ref[...] + b2_ref[...]).astype(o_ref.dtype)


def feed_forward(x, w1, b1, w2, b2, *, tm=256, hid_tile=None,
                 compute_dtype=jnp.bfloat16):
    """FeedForward block of Transformer2D (eval mode).

    x: (..., dim); w1: (hid, dim); b1: (hid,); w2: (dim, hid); b2: (dim,).
    tm: token tile (multiple of 8). 256 suits v6e/v7x; use 128 on v5e.
    hid_tile: optional hid-axis tile (multiple of 128). None keeps both weight
      matrices fully resident in VMEM (best while they fit); set it to bound
      VMEM on very wide layers (v7x 64 MiB/TC) or to shrink the f32 h tile.
    """
    orig_shape, orig_dtype = x.shape, x.dtype
    dim = orig_shape[-1]
    hid = w1.shape[0]
    x2d = x.reshape(-1, dim)
    n_tok = x2d.shape[0]

    # ---- padding: lane-dense feature dims (x128) and token axis (x tm) ----
    dp = _round_up(dim, 128)
    if hid_tile is None or hid_tile >= _round_up(hid, 128):
        th = _round_up(hid, 128)
    else:
        th = _round_up(hid_tile, 128)
    hp = _round_up(_round_up(hid, 128), th)        # multiple of th and of 128

    tm = _round_up(max(8, min(tm, _round_up(n_tok, 8))), 8)
    ntp = _round_up(n_tok, tm)

    cdt = compute_dtype
    x_p = jnp.zeros((ntp, dp), cdt).at[:n_tok, :dim].set(x2d.astype(cdt))
    w1_t = jnp.zeros((dp, hp), cdt).at[:dim, :hid].set(w1.T.astype(cdt))
    w2_t = jnp.zeros((hp, dp), cdt).at[:hid, :dim].set(w2.T.astype(cdt))
    b1_p = jnp.zeros((1, hp), jnp.float32).at[0, :hid].set(b1.astype(jnp.float32))
    b2_p = jnp.zeros((1, dp), jnp.float32).at[0, :dim].set(b2.astype(jnp.float32))

    n_i, n_h = ntp // tm, hp // th
    weights_invariant = (n_h == 1)   # constant index_map -> single-buffer them

    # ---- explicit VMEM budget (x/out tiles double-buffered, acc, weights) ----
    csz = jnp.dtype(cdt).itemsize
    osz = jnp.dtype(orig_dtype).itemsize
    est = (2 * tm * dp * csz                              # x tile (2 bufs)
           + 2 * tm * dp * osz                            # out tile (2 bufs)
           + tm * dp * 4                                  # f32 accumulator
           + (2 - int(weights_invariant)) * 2 * dp * th * csz  # W1/W2 blocks
           + 2 * (th + dp) * 4)                           # biases
    vmem_limit = int(min(64 * 1024 * 1024, max(2 * est, 32 * 1024 * 1024)))

    def build(single_buffer_weights):
        def wspec(shape, index_map):
            if single_buffer_weights and weights_invariant:
                return pl.BlockSpec(shape, index_map,
                                    pipeline_mode=pl.Buffered(1))
            return pl.BlockSpec(shape, index_map)

        grid_spec = pltpu.PrefetchScalarGridSpec(
            num_scalar_prefetch=0,
            grid=(n_i, n_h),
            in_specs=[
                pl.BlockSpec((tm, dp), lambda i, h: (i, 0)),   # x tile
                wspec((dp, th), lambda i, h: (0, h)),          # W1^T slice
                wspec((1, th), lambda i, h: (0, h)),           # b1 slice
                wspec((th, dp), lambda i, h: (h, 0)),          # W2^T slice
                wspec((1, dp), lambda i, h: (0, 0)),           # b2
            ],
            out_specs=pl.BlockSpec((tm, dp), lambda i, h: (i, 0)),
            scratch_shapes=[pltpu.VMEM((tm, dp), jnp.float32)],
        )
        return pl.pallas_call(
            _ffn_kernel,
            out_shape=jax.ShapeDtypeStruct((ntp, dp), orig_dtype),
            grid_spec=grid_spec,
            compiler_params=pltpu.CompilerParams(
                dimension_semantics=("parallel", "arbitrary"),
                vmem_limit_bytes=vmem_limit),
        )

    try:
        out_p = build(True)(x_p, w1_t, b1_p, w2_t, b2_p)
    except Exception:
        # pipeline_mode=pl.Buffered(1) unsupported on this jax version:
        # fall back to default (double-buffered) resident weight blocks.
        out_p = build(False)(x_p, w1_t, b1_p, w2_t, b2_p)

    return out_p[:n_tok, :dim].reshape(orig_shape)


if __name__ == "__main__":
    key = jax.random.PRNGKey(0)
    kx, kw1, kb1, kw2, kb2, kx2, kw3, kb3, kw4, kb4 = jax.random.split(key, 10)

    # --- Config A: toy shapes implied by the module (dim=32, ff_hid_dim=64).
    # 16 tokens -> single grid step; exercises the token/feature padding path.
    batch, seq, dim, hid = 2, 8, 32, 64
    x = jax.random.normal(kx, (batch, seq, dim), dtype=jnp.float32)
    w1 = jax.random.normal(kw1, (hid, dim), dtype=jnp.float32) * 0.05
    b1 = jax.random.normal(kb1, (hid,), dtype=jnp.float32) * 0.05
    w2 = jax.random.normal(kw2, (dim, hid), dtype=jnp.float32) * 0.05
    b2 = jax.random.normal(kb2, (dim,), dtype=jnp.float32) * 0.05

    out = jax.block_until_ready(feed_forward(x, w1, b1, w2, b2))
    ref = jnp.maximum(x @ w1.T + b1, 0.0) @ w2.T + b2
    assert out.shape == x.shape and out.dtype == x.dtype
    assert jnp.allclose(out, ref, atol=2e-2, rtol=2e-2), float(
        jnp.max(jnp.abs(out - ref)))

    # --- Config B: lane-dense shapes exercising tm=256 token tiles and the
    # hid-axis accumulation path (hid_tile < hid).
    B2, S2, D2, H2 = 4, 256, 256, 1024
    x2 = jax.random.normal(kx2, (B2, S2, D2), dtype=jnp.float32)
    w1b = jax.random.normal(kw3, (H2, D2), dtype=jnp.float32) * 0.03
    b1b = jax.random.normal(kb3, (H2,), dtype=jnp.float32) * 0.03
    w2b = jax.random.normal(kw4, (D2, H2), dtype=jnp.float32) * 0.03
    b2b = jax.random.normal(kb4, (D2,), dtype=jnp.float32) * 0.03

    out2 = jax.block_until_ready(
        feed_forward(x2, w1b, b1b, w2b, b2b, tm=256, hid_tile=512))
    ref2 = jnp.maximum(x2 @ w1b.T + b1b, 0.0) @ w2b.T + b2b
    assert out2.shape == x2.shape
    assert jnp.allclose(out2, ref2, atol=5e-2, rtol=5e-2), float(
        jnp.max(jnp.abs(out2 - ref2)))

    print("KERNEL_OK")
</pallas_src>

<mosaic_0001>
module attributes {stable_mosaic.version = 11 : i64} {
  func.func @_ffn_kernel(%arg0: i32, %arg1: i32, %arg2: memref<16x128xbf16, #tpu.memory_space<vmem>>, %arg3: memref<128x128xbf16, #tpu.memory_space<vmem>>, %arg4: memref<1x128xf32, #tpu.memory_space<vmem>>, %arg5: memref<128x128xbf16, #tpu.memory_space<vmem>>, %arg6: memref<1x128xf32, #tpu.memory_space<vmem>>, %arg7: memref<16x128xf32, #tpu.memory_space<vmem>>, %arg8: memref<16x128xf32, #tpu.memory_space<vmem>>) attributes {dimension_semantics = [#tpu.dimension_semantics<parallel>, #tpu.dimension_semantics<arbitrary>], iteration_bounds = array<i64: 1, 1>, scalar_prefetch = 0 : i64, scratch_operands = 1 : i64, tpu.core_type = #tpu.core_type<tc>, window_params = [{transform_indices = @transform_0, window_bounds = array<i64: 16, 128>}, {pipeline_mode = #tpu.pipeline_mode<synchronous>, transform_indices = @transform_1, window_bounds = array<i64: 128, 128>}, {pipeline_mode = #tpu.pipeline_mode<synchronous>, transform_indices = @transform_2, window_bounds = array<i64: 1, 128>}, {pipeline_mode = #tpu.pipeline_mode<synchronous>, transform_indices = @transform_3, window_bounds = array<i64: 128, 128>}, {pipeline_mode = #tpu.pipeline_mode<synchronous>, transform_indices = @transform_4, window_bounds = array<i64: 1, 128>}, {transform_indices = @transform_5, window_bounds = array<i64: 16, 128>}]} {
    %c0_i32 = arith.constant 0 : i32
    %0 = arith.cmpi eq, %arg1, %c0_i32 : i32
    %1 = arith.extui %0 : i1 to i32
    %c0_i32_0 = arith.constant 0 : i32
    %2 = arith.cmpi ne, %1, %c0_i32_0 : i32
    scf.if %2 {
      %cst_16 = arith.constant 0.000000e+00 : f32
      %20 = vector.broadcast %cst_16 : f32 to vector<16x128xf32>
      %c0_17 = arith.constant 0 : index
      %c0_18 = arith.constant 0 : index
      %21 = vector.load %arg8[%c0_17, %c0_18] : memref<16x128xf32, #tpu.memory_space<vmem>>, vector<16x128xf32>
      tpu.vector_store %arg8[%c0_17, %c0_18], %20 {strides = array<i32>} : memref<16x128xf32, #tpu.memory_space<vmem>>, vector<16x128xf32>,
    } else {
    }
    %c0 = arith.constant 0 : index
    %c0_1 = arith.constant 0 : index
    %3 = vector.load %arg2[%c0, %c0_1] : memref<16x128xbf16, #tpu.memory_space<vmem>>, vector<16x128xbf16>
    %c0_2 = arith.constant 0 : index
    %c0_3 = arith.constant 0 : index
    %4 = vector.load %arg3[%c0_2, %c0_3] : memref<128x128xbf16, #tpu.memory_space<vmem>>, vector<128x128xbf16>
    %cst = arith.constant dense<0.000000e+00> : vector<16x128xf32>
    %5 = tpu.matmul %3, %4, %cst {dimension_numbers = #tpu.dot_dimension_numbers<[1], [0], [0], [1], [0, 0, 1, 1], [], []>} : vector<16x128xbf16>, vector<128x128xbf16>, vector<16x128xf32> -> vector<16x128xf32>
    %c0_4 = arith.constant 0 : index
    %c0_5 = arith.constant 0 : index
    %6 = vector.load %arg4[%c0_4, %c0_5] : memref<1x128xf32, #tpu.memory_space<vmem>>, vector<1x128xf32>
    %7 = vector.broadcast %6 : vector<1x128xf32> to vector<16x128xf32>
    %8 = arith.addf %5, %7 : vector<16x128xf32>
    %cst_6 = arith.constant 0.000000e+00 : f32
    %9 = vector.broadcast %cst_6 : f32 to vector<16x128xf32>
    %10 = arith.maximumf %8, %9 : vector<16x128xf32>
    %c0_7 = arith.constant 0 : index
    %c0_8 = arith.constant 0 : index
    %11 = vector.load %arg8[%c0_7, %c0_8] : memref<16x128xf32, #tpu.memory_space<vmem>>, vector<16x128xf32>
    %12 = arith.truncf %10 : vector<16x128xf32> to vector<16x128xbf16>
    %c0_9 = arith.constant 0 : index
    %c0_10 = arith.constant 0 : index
    %13 = vector.load %arg5[%c0_9, %c0_10] : memref<128x128xbf16, #tpu.memory_space<vmem>>, vector<128x128xbf16>
    %cst_11 = arith.constant dense<0.000000e+00> : vector<16x128xf32>
    %14 = tpu.matmul %12, %13, %cst_11 {dimension_numbers = #tpu.dot_dimension_numbers<[1], [0], [0], [1], [0, 0, 1, 1], [], []>} : vector<16x128xbf16>, vector<128x128xbf16>, vector<16x128xf32> -> vector<16x128xf32>
    %15 = arith.addf %11, %14 : vector<16x128xf32>
    %c0_12 = arith.constant 0 : index
    %c0_13 = arith.constant 0 : index
    %16 = vector.load %arg8[%c0_12, %c0_13] : memref<16x128xf32, #tpu.memory_space<vmem>>, vector<16x128xf32>
    tpu.vector_store %arg8[%c0_12, %c0_13], %15 {strides = array<i32>} : memref<16x128xf32, #tpu.memory_space<vmem>>, vector<16x128xf32>,
    %c0_i32_14 = arith.constant 0 : i32
    %17 = arith.cmpi eq, %arg1, %c0_i32_14 : i32
    %18 = arith.extui %17 : i1 to i32
    %c0_i32_15 = arith.constant 0 : i32
    %19 = arith.cmpi ne, %18, %c0_i32_15 : i32
    scf.if %19 {
      %c0_16 = arith.constant 0 : index
      %c0_17 = arith.constant 0 : index
      %20 = vector.load %arg8[%c0_16, %c0_17] : memref<16x128xf32, #tpu.memory_space<vmem>>, vector<16x128xf32>
      %c0_18 = arith.constant 0 : index
      %c0_19 = arith.constant 0 : index
      %21 = vector.load %arg6[%c0_18, %c0_19] : memref<1x128xf32, #tpu.memory_space<vmem>>, vector<1x128xf32>
      %22 = vector.broadcast %21 : vector<1x128xf32> to vector<16x128xf32>
      %23 = arith.addf %20, %22 : vector<16x128xf32>
      %c0_20 = arith.constant 0 : index
      %c0_21 = arith.constant 0 : index
      %24 = vector.load %arg7[%c0_20, %c0_21] : memref<16x128xf32, #tpu.memory_space<vmem>>, vector<16x128xf32>
      tpu.vector_store %arg7[%c0_20, %c0_21], %23 {strides = array<i32>} : memref<16x128xf32, #tpu.memory_space<vmem>>, vector<16x128xf32>,
    } else {
    }
    return
  }
  func.func @transform_0(%arg0: i32, %arg1: i32) -> (i32, i32) {
    %c0_i32 = arith.constant 0 : i32
    %c0_i32_0 = arith.constant 0 : i32
    return %arg0, %c0_i32 : i32, i32
  }
  func.func @transform_1(%arg0: i32, %arg1: i32) -> (i32, i32) {
    %c0_i32 = arith.constant 0 : i32
    %c0_i32_0 = arith.constant 0 : i32
    return %c0_i32, %arg1 : i32, i32
  }
  func.func @transform_2(%arg0: i32, %arg1: i32) -> (i32, i32) {
    %c0_i32 = arith.constant 0 : i32
    %c0_i32_0 = arith.constant 0 : i32
    return %c0_i32, %arg1 : i32, i32
  }
  func.func @transform_3(%arg0: i32, %arg1: i32) -> (i32, i32) {
    %c0_i32 = arith.constant 0 : i32
    %c0_i32_0 = arith.constant 0 : i32
    return %arg1, %c0_i32 : i32, i32
  }
  func.func @transform_4(%arg0: i32, %arg1: i32) -> (i32, i32) {
    %c0_i32 = arith.constant 0 : i32
    %c0_i32_0 = arith.constant 0 : i32
    %c0_i32_1 = arith.constant 0 : i32
    return %c0_i32, %c0_i32_0 : i32, i32
  }
  func.func @transform_5(%arg0: i32, %arg1: i32) -> (i32, i32) {
    %c0_i32 = arith.constant 0 : i32
    %c0_i32_0 = arith.constant 0 : i32
    return %arg0, %c0_i32 : i32, i32
  }
}

module attributes {stable_mosaic.version = 11 : i64} {
  func.func @_ffn_kernel(%arg0: i32, %arg1: i32, %arg2: memref<16x128xbf16, #tpu.memory_space<vmem>>, %arg3: memref<128x128xbf16, #tpu.memory_space<vmem>>, %arg4: memref<1x128xf32, #tpu.memory_space<vmem>>, %arg5: memref<128x128xbf16, #tpu.memory_space<vmem>>, %arg6: memref<1x128xf32, #tpu.memory_space<vmem>>, %arg7: memref<16x128xf32, #tpu.memory_space<vmem>>, %arg8: memref<16x128xf32, #tpu.memory_space<vmem>>) attributes {dimension_semantics = [#tpu.dimension_semantics<parallel>, #tpu.dimension_semantics<arbitrary>], iteration_bounds = array<i64: 1, 1>, scalar_prefetch = 0 : i64, scratch_operands = 1 : i64, tpu.core_type = #tpu.core_type<tc>, window_params = [{transform_indices = @transform_0, window_bounds = array<i64: 16, 128>}, {transform_indices = @transform_1, window_bounds = array<i64: 128, 128>}, {transform_indices = @transform_2, window_bounds = array<i64: 1, 128>}, {transform_indices = @transform_3, window_bounds = array<i64: 128, 128>}, {pipeline_mode = #tpu.pipeline_mode<synchronous>, transform_indices = @transform_4, window_bounds = array<i64: 1, 128>}, {transform_indices = @transform_5, window_bounds = array<i64: 16, 128>}]} {
    %c0_i32 = arith.constant 0 : i32
    %0 = arith.cmpi eq, %arg1, %c0_i32 : i32
    %1 = arith.extui %0 : i1 to i32
    %c0_i32_0 = arith.constant 0 : i32
    %2 = arith.cmpi ne, %1, %c0_i32_0 : i32
    scf.if %2 {
      %cst_16 = arith.constant 0.000000e+00 : f32
      %20 = vector.broadcast %cst_16 : f32 to vector<16x128xf32>
      %c0_17 = arith.constant 0 : index
      %c0_18 = arith.constant 0 : index
      %21 = vector.load %arg8[%c0_17, %c0_18] : memref<16x128xf32, #tpu.memory_space<vmem>>, vector<16x128xf32>
      tpu.vector_store %arg8[%c0_17, %c0_18], %20 {strides = array<i32>} : memref<16x128xf32, #tpu.memory_space<vmem>>, vector<16x128xf32>,
    } else {
    }
    %c0 = arith.constant 0 : index
    %c0_1 = arith.constant 0 : index
    %3 = vector.load %arg2[%c0, %c0_1] : memref<16x128xbf16, #tpu.memory_space<vmem>>, vector<16x128xbf16>
    %c0_2 = arith.constant 0 : index
    %c0_3 = arith.constant 0 : index
    %4 = vector.load %arg3[%c0_2, %c0_3] : memref<128x128xbf16, #tpu.memory_space<vmem>>, vector<128x128xbf16>
    %cst = arith.constant dense<0.000000e+00> : vector<16x128xf32>
    %5 = tpu.matmul %3, %4, %cst {dimension_numbers = #tpu.dot_dimension_numbers<[1], [0], [0], [1], [0, 0, 1, 1], [], []>} : vector<16x128xbf16>, vector<128x128xbf16>, vector<16x128xf32> -> vector<16x128xf32>
    %c0_4 = arith.constant 0 : index
    %c0_5 = arith.constant 0 : index
    %6 = vector.load %arg4[%c0_4, %c0_5] : memref<1x128xf32, #tpu.memory_space<vmem>>, vector<1x128xf32>
    %7 = vector.broadcast %6 : vector<1x128xf32> to vector<16x128xf32>
    %8 = arith.addf %5, %7 : vector<16x128xf32>
    %cst_6 = arith.constant 0.000000e+00 : f32
    %9 = vector.broadcast %cst_6 : f32 to vector<16x128xf32>
    %10 = arith.maximumf %8, %9 : vector<16x128xf32>
    %c0_7 = arith.constant 0 : index
    %c0_8 = arith.constant 0 : index
    %11 = vector.load %arg8[%c0_7, %c0_8] : memref<16x128xf32, #tpu.memory_space<vmem>>, vector<16x128xf32>
    %12 = arith.truncf %10 : vector<16x128xf32> to vector<16x128xbf16>
    %c0_9 = arith.constant 0 : index
    %c0_10 = arith.constant 0 : index
    %13 = vector.load %arg5[%c0_9, %c0_10] : memref<128x128xbf16, #tpu.memory_space<vmem>>, vector<128x128xbf16>
    %cst_11 = arith.constant dense<0.000000e+00> : vector<16x128xf32>
    %14 = tpu.matmul %12, %13, %cst_11 {dimension_numbers = #tpu.dot_dimension_numbers<[1], [0], [0], [1], [0, 0, 1, 1], [], []>} : vector<16x128xbf16>, vector<128x128xbf16>, vector<16x128xf32> -> vector<16x128xf32>
    %15 = arith.addf %11, %14 : vector<16x128xf32>
    %c0_12 = arith.constant 0 : index
    %c0_13 = arith.constant 0 : index
    %16 = vector.load %arg8[%c0_12, %c0_13] : memref<16x128xf32, #tpu.memory_space<vmem>>, vector<16x128xf32>
    tpu.vector_store %arg8[%c0_12, %c0_13], %15 {strides = array<i32>} : memref<16x128xf32, #tpu.memory_space<vmem>>, vector<16x128xf32>,
    %c0_i32_14 = arith.constant 0 : i32
    %17 = arith.cmpi eq, %arg1, %c0_i32_14 : i32
    %18 = arith.extui %17 : i1 to i32
    %c0_i32_15 = arith.constant 0 : i32
    %19 = arith.cmpi ne, %18, %c0_i32_15 : i32
    scf.if %19 {
      %c0_16 = arith.constant 0 : index
      %c0_17 = arith.constant 0 : index
      %20 = vector.load %arg8[%c0_16, %c0_17] : memref<16x128xf32, #tpu.memory_space<vmem>>, vector<16x128xf32>
      %c0_18 = arith.constant 0 : index
      %c0_19 = arith.constant 0 : index
      %21 = vector.load %arg6[%c0_18, %c0_19] : memref<1x128xf32, #tpu.memory_space<vmem>>, vector<1x128xf32>
      %22 = vector.broadcast %21 : vector<1x128xf32> to vector<16x128xf32>
      %23 = arith.addf %20, %22 : vector<16x128xf32>
      %c0_20 = arith.constant 0 : index
      %c0_21 = arith.constant 0 : index
      %24 = vector.load %arg7[%c0_20, %c0_21] : memref<16x128xf32, #tpu.memory_space<vmem>>, vector<16x128xf32>
      tpu.vector_store %arg7[%c0_20, %c0_21], %23 {strides = array<i32>} : memref<16x128xf32, #tpu.memory_space<vmem>>, vector<16x128xf32>,
    } else {
    }
    return
  }
  func.func @transform_0(%arg0: i32, %arg1: i32) -> (i32, i32) {
    %c0_i32 = arith.constant 0 : i32
    %c0_i32_0 = arith.constant 0 : i32
    return %arg0, %c0_i32 : i32, i32
  }
  func.func @transform_1(%arg0: i32, %arg1: i32) -> (i32, i32) {
    %c0_i32 = arith.constant 0 : i32
    %c0_i32_0 = arith.constant 0 : i32
    return %c0_i32, %arg1 : i32, i32
  }
  func.func @transform_2(%arg0: i32, %arg1: i32) -> (i32, i32) {
    %c0_i32 = arith.constant 0 : i32
    %c0_i32_0 = arith.constant 0 : i32
    return %c0_i32, %arg1 : i32, i32
  }
  func.func @transform_3(%arg0: i32, %arg1: i32) -> (i32, i32) {
    %c0_i32 = arith.constant 0 : i32
    %c0_i32_0 = arith.constant 0 : i32
    return %arg1, %c0_i32 : i32, i32
  }
  func.func @transform_4(%arg0: i32, %arg1: i32) -> (i32, i32) {
    %c0_i32 = arith.constant 0 : i32
    %c0_i32_0 = arith.constant 0 : i32
    %c0_i32_1 = arith.constant 0 : i32
    return %c0_i32, %c0_i32_0 : i32, i32
  }
  func.func @transform_5(%arg0: i32, %arg1: i32) -> (i32, i32) {
    %c0_i32 = arith.constant 0 : i32
    %c0_i32_0 = arith.constant 0 : i32
    return %arg0, %c0_i32 : i32, i32
  }
}

</mosaic_0001>

<bundles_post_ra>
// kernel: tpu_custom_call.1
= control target key start
LH: loop header
LB: loop body
LE: loop exit
PB: predicated region body
PF: predicated region fallthrough
CT: control target
= control target key end

     0   :  { %10 = vsyncpa [#allocation4], 0  ;;  %s645_s0 = inlined_call_operand.hbm [shape: bf16[16,128], index: 0, kind: input, shape index: {}]   ;;  %s646_s1 = inlined_call_operand.hbm [shape: bf16[128,128], index: 1, kind: input, shape index: {}]   ;;  %s647_s2 = inlined_call_operand.vmem [shape: f32[1,128], index: 2, kind: input, shape index: {}]   ;;  %s648_s3 = inlined_call_operand.hbm [shape: bf16[128,128], index: 3, kind: input, shape index: {}]   ;;  %s649_s4 = inlined_call_operand.vmem [shape: f32[1,128], index: 4, kind: input, shape index: {}]   ;;  %s650_s5 = inlined_call_operand.hbm [shape: f32[16,128], index: 5, kind: output, shape index: {}]  }
   0x1   :  { %11 = vsyncpa [#allocation7], 0 }
   0x2   :  { %12 = vsyncpa [#allocation5], 0  ;;  %s535_s18 = smov [#allocation6]   ;;  %s536_s20 = smov [#allocation3]  }
   0x3   :  { %s30_s19 = sshll.u32 %s535_s18, 4  ;;  %s18_s21 = sshll.u32 %s536_s20, 4  ;;  %s31_s19 = int_to_ptr.vmem [resolvable:$true] %s30_s19  ;;  %s575_s21 = int_to_ptr.vmem [resolvable:$true] %s18_s21 }
   0x4   :  { %s441_s24 = scalar_lea.hbm %s646_s1, 1024 }
   0x5   :  { %p442_p0 = scmp.ne.s32.totalorder %s646_s1, %s441_s24  ;;  %p445_p1 = scmp.lt.u32.totalorder %s441_s24, %s646_s1 }
   0x7   :  { %p447_p2 = pnand %p445_p1, %p442_p0 }
   0x9   :  { %450 = shalt.err (!%p447_p2)
}
   0xa   :  { %s451_s29 = scalar_lea.vmem %s31_s19, 1024  ;;  %p456_p4 = scmp.lt.s32.totalorder %s31_s19, %s31_s19 }
   0xb   :  { %p452_p3 = scmp.ne.s32.totalorder %s31_s19, %s451_s29  ;;  %p457_p5 = scmp.lt.s32.totalorder %s451_s29, %s451_s29 }
   0xd   :  { %p458_p6 = por %p457_p5, %p456_p4 }
   0xf   :  { %p459_p7 = pnand %p458_p6, %p452_p3 }
  0x11   :  { %462 = shalt.err (!%p459_p7)
}
  0x12   :  { %s537_s30 = smov 64   ;;  %s538_s6 = smov 4  }
  0x13   :  { %36 = dma.hbm_to_vmem [thread:$0]  %s646_s1, 1024, %s31_s19, [#allocation7], %s537_s30, %s537_s30, %s538_s6  }
  0x14   :  { %s463_s11 = scalar_lea.hbm %s645_s0, 128 }
  0x15   :  { %p464_p8 = scmp.ne.s32.totalorder %s645_s0, %s463_s11  ;;  %p467_p9 = scmp.lt.u32.totalorder %s463_s11, %s645_s0 }
  0x17   :  { %p469_p10 = pnand %p467_p9, %p464_p8 }
  0x19   :  { %472 = shalt.err (!%p469_p10)
}
  0x1a   :  { %s473_s16 = scalar_lea.vmem %s575_s21, 128  ;;  %p478_p12 = scmp.lt.s32.totalorder %s575_s21, %s575_s21 }
  0x1b   :  { %p474_p11 = scmp.ne.s32.totalorder %s575_s21, %s473_s16  ;;  %p479_p13 = scmp.lt.s32.totalorder %s473_s16, %s473_s16 }
  0x1d   :  { %p480_p0 = por %p479_p13, %p478_p12 }
  0x1f   :  { %p481_p1 = pnand %p480_p0, %p474_p11 }
  0x21   :  { %484 = shalt.err (!%p481_p1)
}
  0x22   :  { %24 = dma.hbm_to_vmem [thread:$0]  %s645_s0, 128, %s575_s21, [#allocation4], %s537_s30, %s537_s30, %s538_s6  }
  0x23   :  { %s539_s18 = smov [#allocation8]   ;;  %s485_s23 = scalar_lea.hbm %s648_s3, 1024 }
  0x24   :  { %s44_s19 = sshll.u32 %s539_s18, 4  ;;  %p486_p2 = scmp.ne.s32.totalorder %s648_s3, %s485_s23  ;;  %s45_s19 = int_to_ptr.vmem [resolvable:$true] %s44_s19 }
  0x25   :  { %p489_p3 = scmp.lt.u32.totalorder %s485_s23, %s648_s3 }
  0x27   :  { %p491_p4 = pnand %p489_p3, %p486_p2 }
  0x29   :  { %494 = shalt.err (!%p491_p4)
}
  0x2a   :  { %s495_s28 = scalar_lea.vmem %s45_s19, 1024  ;;  %p500_p6 = scmp.lt.s32.totalorder %s45_s19, %s45_s19 }
  0x2b   :  { %p496_p5 = scmp.ne.s32.totalorder %s45_s19, %s495_s28  ;;  %p501_p7 = scmp.lt.s32.totalorder %s495_s28, %s495_s28 }
  0x2d   :  { %p502_p8 = por %p501_p7, %p500_p6 }
  0x2f   :  { %p503_p9 = pnand %p502_p8, %p496_p5 }
  0x31   :  { %506 = shalt.err (!%p503_p9)
}
  0x32   :  { %50 = dma.hbm_to_vmem [thread:$0]  %s648_s3, 1024, %s45_s19, [#allocation7], %s537_s30, %s537_s30, %s538_s6  }
  0x33   :  { %529 = dma.done.wait [#allocation4], 128  }
  0x34   :  { %530 = vsyncadd [#allocation4], 4294967168 }
  0x35   :  { %531 = dma.done.wait [#allocation7], 2048  }
  0x36   :  { %532 = vsyncadd [#allocation7], 4294965248  ;;  %v540_v0 = vmov 0.0   ;;  %vm541_vm0 = vmmov 0   ;;  %v424_v1 = vld [vmem:[#allocation6] sm:$0xff]   ;;  %v425_v2 = vld [vmem:[#allocation6 + $0x8] sm:$0xff]  }
  0x37   :  { %374 = vmatprep.subr.bf16.mxu0 %v540_v0  ;;  %390 = vmatprep.mubr.msk.bf16.mxu0 %vm541_vm0, %v540_v0  ;;  %v426_v3 = vld [vmem:[#allocation6 + $0x10] sm:$0xff]   ;;  %v433_v4 = vld [vmem:[#allocation8] sm:$0xff]   ;;  %v427_v5 = vld [vmem:[#allocation6 + $0x18] sm:$0xff]   ;;  %s542_s7 = smov [#allocation9]  }
  0x38   :  { %394 = vmatprep.subr.bf16.mxu1 %v540_v0  ;;  %410 = vmatprep.mubr.msk.bf16.mxu1 %vm541_vm0, %v540_v0  ;;  %v434_v6 = vld [vmem:[#allocation8 + $0x8] sm:$0xff]   ;;  %v428_v7 = vld [vmem:[#allocation6 + $0x20] sm:$0xff]   ;;  %v435_v8 = vld [vmem:[#allocation8 + $0x10] sm:$0xff]   ;;  %s324_s8 = sshll.u32 %s542_s7, 4  ;;  %s325_s8 = int_to_ptr.vmem [resolvable:$true] %s324_s8 }
  0x39   :  { %375 = vmatpush3.bf16.msra.mxu0 %v424_v1  ;;  %395 = vmatpush3.bf16.msra.mxu1 %v433_v4  ;;  %v429_v9 = vld [vmem:[#allocation6 + $0x28] sm:$0xff]   ;;  %v436_v10 = vld [vmem:[#allocation8 + $0x18] sm:$0xff]   ;;  %v430_v11 = vld [vmem:[#allocation6 + $0x30] sm:$0xff]   ;;  %p512_p11 = scmp.lt.s32.totalorder %s325_s8, %s325_s8 }
  0x3a   :  { %376 = vmatprep.subr.bf16.mxu0 %v540_v0  ;;  %396 = vmatprep.subr.bf16.mxu1 %v540_v0  ;;  %v437_v12 = vld [vmem:[#allocation8 + $0x20] sm:$0xff]   ;;  %v431_v13 = vld [vmem:[#allocation6 + $0x38] sm:$0xff]   ;;  %v438_v14 = vld [vmem:[#allocation8 + $0x28] sm:$0xff]  }
  0x3b   :  { %v432_v15 = vld [vmem:[#allocation3] sm:$0xff]   ;;  %v439_v16 = vld [vmem:[#allocation8 + $0x30] sm:$0xff]  }
  0x3c   :  { %v440_v17 = vld [vmem:[#allocation8 + $0x38] sm:$0xff]  }
  0x3d   :  { %377 = vmatpush3.bf16.msra.mxu0 %v425_v2  ;;  %397 = vmatpush3.bf16.msra.mxu1 %v434_v6  ;;  %v337_v18 = vld [vmem:[%s647_s2] ss:$0 sm:$0xff]  ;;  %s507_s2 = scalar_lea.vmem %s325_s8, 256 }
  0x3e   :  { %378 = vmatprep.subr.bf16.mxu0 %v540_v0  ;;  %398 = vmatprep.subr.bf16.mxu1 %v540_v0  ;;  %v355_v28 = vld [vmem:[%s649_s4] ss:$0 sm:$0xff]  ;;  %p508_p10 = scmp.ne.s32.totalorder %s325_s8, %s507_s2  ;;  %p513_p12 = scmp.lt.s32.totalorder %s507_s2, %s507_s2 }
  0x40   :  { %p514_p13 = por %p513_p12, %p512_p11 }
  0x41   :  { %379 = vmatpush3.bf16.msra.mxu0 %v426_v3  ;;  %399 = vmatpush3.bf16.msra.mxu1 %v435_v8 }
  0x42   :  { %380 = vmatprep.subr.bf16.mxu0 %v540_v0  ;;  %400 = vmatprep.subr.bf16.mxu1 %v540_v0  ;;  %p515_p0 = pnand %p514_p13, %p508_p10 }
  0x45   :  { %381 = vmatpush3.bf16.msra.mxu0 %v427_v5  ;;  %401 = vmatpush3.bf16.msra.mxu1 %v436_v10 }
  0x46   :  { %382 = vmatprep.subr.bf16.mxu0 %v540_v0  ;;  %402 = vmatprep.subr.bf16.mxu1 %v540_v0 }
  0x49   :  { %383 = vmatpush3.bf16.msra.mxu0 %v428_v7  ;;  %403 = vmatpush3.bf16.msra.mxu1 %v437_v12 }
  0x4a   :  { %384 = vmatprep.subr.bf16.mxu0 %v540_v0  ;;  %404 = vmatprep.subr.bf16.mxu1 %v540_v0 }
  0x4d   :  { %385 = vmatpush3.bf16.msra.mxu0 %v429_v9  ;;  %405 = vmatpush3.bf16.msra.mxu1 %v438_v14 }
  0x4e   :  { %386 = vmatprep.subr.bf16.mxu0 %v540_v0  ;;  %406 = vmatprep.subr.bf16.mxu1 %v540_v0 }
  0x51   :  { %387 = vmatpush3.bf16.msra.mxu0 %v430_v11  ;;  %407 = vmatpush3.bf16.msra.mxu1 %v439_v16 }
  0x52   :  { %388 = vmatprep.subr.bf16.mxu0 %v540_v0  ;;  %408 = vmatprep.subr.bf16.mxu1 %v540_v0 }
  0x55   :  { %389 = vmatpush3.bf16.msra.mxu0 %v431_v13  ;;  %409 = vmatpush3.bf16.msra.mxu1 %v440_v17 }
  0x58   :  { %391 = vmatmul.mubr.bf16.vlgmr.msra.gmra.mrb[0].mxu0 %v432_v15 }
 0x12b   :  { %v182_v19 = vpop.f32.mrb[0].mxu0 }
 0x12c   :  { %v183_v20 = vadd.f32 %v337_v18, %v182_v19  ;;  %v392_v21 = vpop.f32.mrb[1].mxu0 }
 0x12d   :  { %v185_v22 = vpop.f32.mrb[2].mxu0 }
 0x12e   :  { %v186_v23 = vadd.f32 %v337_v18, %v185_v22  ;;  %v393_v24 = vpop.f32.mrb[3].mxu0  ;;  %v189_v25 = vmax.f32 %v183_v20, 0.0 }
 0x130   :  { %v190_v26 = vmax.f32 %v186_v23, 0.0 }
 0x132   :  { %v193_v27 = vpack.c.bf16 %v190_v26, %v189_v25 }
 0x134   :  { %411 = vmatmul.mubr.bf16.vlgmr.msra.gmra.mrb[0].mxu1 %v193_v27 }
 0x207   :  { %v292_v29 = vpop.f32.mrb[0].mxu1 }
 0x208   :  { %v315_v30 = vadd.f32 %v355_v28, %v292_v29  ;;  %v412_v31 = vpop.f32.mrb[1].mxu1 }
 0x209   :  { %v295_v32 = vpop.f32.mrb[2].mxu1 }
 0x20a   :  { %317 = vst [vmem:[#allocation9] sm:$0xff] %v315_v30  ;;  %v316_v33 = vadd.f32 %v355_v28, %v295_v32  ;;  %v413_v34 = vpop.f32.mrb[3].mxu1 }
 0x20c   :  { %318 = vst [vmem:[#allocation9 + $0x8] sm:$0xff] %v316_v33 }
 0x20d   :  { %518 = shalt.err (!%p515_p0)
}
 0x20e   :  { %s519_s10 = scalar_lea.hbm %s650_s5, 256 }
 0x20f   :  { %p520_p1 = scmp.ne.s32.totalorder %s650_s5, %s519_s10  ;;  %p523_p2 = scmp.lt.u32.totalorder %s519_s10, %s650_s5 }
 0x211   :  { %p525_p3 = pnand %p523_p2, %p520_p1 }
 0x213   :  { %528 = shalt.err (!%p525_p3)
}
 0x214   :  { %s543_s15 = smov 128   ;;  %s544_s16 = smov 8  }
 0x215   :  { %330 = dma.vmem_to_hbm [thread:$0]  %s325_s8, 256, %s650_s5, [#allocation5], %s543_s15, %s543_s15, %s544_s16  }
 0x216   :  { %533 = dma.done.wait [#allocation5], 256  }
 0x217   :  { %534 = vsyncadd [#allocation5], 4294967040 }
 0x218   :  { %334 = vsyncpa [#allocation4], 1 }
 0x219   :  { %335 = vsyncpa [#allocation7], 1 }
 0x21a   :  { %336 = vsyncpa [#allocation5], 1 }

// kernel: tpu_custom_call.1
= control target key start
LH: loop header
LB: loop body
LE: loop exit
PB: predicated region body
PF: predicated region fallthrough
CT: control target
= control target key end

     0   :  { %10 = vsyncpa [#allocation4], 0  ;;  %s645_s0 = inlined_call_operand.hbm [shape: bf16[16,128], index: 0, kind: input, shape index: {}]   ;;  %s646_s1 = inlined_call_operand.hbm [shape: bf16[128,128], index: 1, kind: input, shape index: {}]   ;;  %s647_s2 = inlined_call_operand.vmem [shape: f32[1,128], index: 2, kind: input, shape index: {}]   ;;  %s648_s3 = inlined_call_operand.hbm [shape: bf16[128,128], index: 3, kind: input, shape index: {}]   ;;  %s649_s4 = inlined_call_operand.vmem [shape: f32[1,128], index: 4, kind: input, shape index: {}]   ;;  %s650_s5 = inlined_call_operand.hbm [shape: f32[16,128], index: 5, kind: output, shape index: {}]  }
   0x1   :  { %11 = vsyncpa [#allocation7], 0 }
   0x2   :  { %12 = vsyncpa [#allocation5], 0  ;;  %s535_s18 = smov [#allocation6]   ;;  %s536_s20 = smov [#allocation3]  }
   0x3   :  { %s30_s19 = sshll.u32 %s535_s18, 4  ;;  %s18_s21 = sshll.u32 %s536_s20, 4  ;;  %s31_s19 = int_to_ptr.vmem [resolvable:$true] %s30_s19  ;;  %s575_s21 = int_to_ptr.vmem [resolvable:$true] %s18_s21 }
   0x4   :  { %s441_s24 = scalar_lea.hbm %s646_s1, 1024 }
   0x5   :  { %p442_p0 = scmp.ne.s32.totalorder %s646_s1, %s441_s24  ;;  %p445_p1 = scmp.lt.u32.totalorder %s441_s24, %s646_s1 }
   0x7   :  { %p447_p2 = pnand %p445_p1, %p442_p0 }
   0x9   :  { %450 = shalt.err (!%p447_p2)
}
   0xa   :  { %s451_s29 = scalar_lea.vmem %s31_s19, 1024  ;;  %p456_p4 = scmp.lt.s32.totalorder %s31_s19, %s31_s19 }
   0xb   :  { %p452_p3 = scmp.ne.s32.totalorder %s31_s19, %s451_s29  ;;  %p457_p5 = scmp.lt.s32.totalorder %s451_s29, %s451_s29 }
   0xd   :  { %p458_p6 = por %p457_p5, %p456_p4 }
   0xf   :  { %p459_p7 = pnand %p458_p6, %p452_p3 }
  0x11   :  { %462 = shalt.err (!%p459_p7)
}
  0x12   :  { %s537_s30 = smov 64   ;;  %s538_s6 = smov 4  }
  0x13   :  { %36 = dma.hbm_to_vmem [thread:$0]  %s646_s1, 1024, %s31_s19, [#allocation7], %s537_s30, %s537_s30, %s538_s6  }
  0x14   :  { %s463_s11 = scalar_lea.hbm %s645_s0, 128 }
  0x15   :  { %p464_p8 = scmp.ne.s32.totalorder %s645_s0, %s463_s11  ;;  %p467_p9 = scmp.lt.u32.totalorder %s463_s11, %s645_s0 }
  0x17   :  { %p469_p10 = pnand %p467_p9, %p464_p8 }
  0x19   :  { %472 = shalt.err (!%p469_p10)
}
  0x1a   :  { %s473_s16 = scalar_lea.vmem %s575_s21, 128  ;;  %p478_p12 = scmp.lt.s32.totalorder %s575_s21, %s575_s21 }
  0x1b   :  { %p474_p11 = scmp.ne.s32.totalorder %s575_s21, %s473_s16  ;;  %p479_p13 = scmp.lt.s32.totalorder %s473_s16, %s473_s16 }
  0x1d   :  { %p480_p0 = por %p479_p13, %p478_p12 }
  0x1f   :  { %p481_p1 = pnand %p480_p0, %p474_p11 }
  0x21   :  { %484 = shalt.err (!%p481_p1)
}
  0x22   :  { %24 = dma.hbm_to_vmem [thread:$0]  %s645_s0, 128, %s575_s21, [#allocation4], %s537_s30, %s537_s30, %s538_s6  }
  0x23   :  { %s539_s18 = smov [#allocation8]   ;;  %s485_s23 = scalar_lea.hbm %s648_s3, 1024 }
  0x24   :  { %s44_s19 = sshll.u32 %s539_s18, 4  ;;  %p486_p2 = scmp.ne.s32.totalorder %s648_s3, %s485_s23  ;;  %s45_s19 = int_to_ptr.vmem [resolvable:$true] %s44_s19 }
  0x25   :  { %p489_p3 = scmp.lt.u32.totalorder %s485_s23, %s648_s3 }
  0x27   :  { %p491_p4 = pnand %p489_p3, %p486_p2 }
  0x29   :  { %494 = shalt.err (!%p491_p4)
}
  0x2a   :  { %s495_s28 = scalar_lea.vmem %s45_s19, 1024  ;;  %p500_p6 = scmp.lt.s32.totalorder %s45_s19, %s45_s19 }
  0x2b   :  { %p496_p5 = scmp.ne.s32.totalorder %s45_s19, %s495_s28  ;;  %p501_p7 = scmp.lt.s32.totalorder %s495_s28, %s495_s28 }
  0x2d   :  { %p502_p8 = por %p501_p7, %p500_p6 }
  0x2f   :  { %p503_p9 = pnand %p502_p8, %p496_p5 }
  0x31   :  { %506 = shalt.err (!%p503_p9)
}
  0x32   :  { %50 = dma.hbm_to_vmem [thread:$0]  %s648_s3, 1024, %s45_s19, [#allocation7], %s537_s30, %s537_s30, %s538_s6  }
  0x33   :  { %529 = dma.done.wait [#allocation4], 128  }
  0x34   :  { %530 = vsyncadd [#allocation4], 4294967168 }
  0x35   :  { %531 = dma.done.wait [#allocation7], 2048  }
  0x36   :  { %532 = vsyncadd [#allocation7], 4294965248  ;;  %v540_v0 = vmov 0.0   ;;  %vm541_vm0 = vmmov 0   ;;  %v424_v1 = vld [vmem:[#allocation6] sm:$0xff]   ;;  %v425_v2 = vld [vmem:[#allocation6 + $0x8] sm:$0xff]  }
  0x37   :  { %374 = vmatprep.subr.bf16.mxu0 %v540_v0  ;;  %390 = vmatprep.mubr.msk.bf16.mxu0 %vm541_vm0, %v540_v0  ;;  %v426_v3 = vld [vmem:[#allocation6 + $0x10] sm:$0xff]   ;;  %v433_v4 = vld [vmem:[#allocation8] sm:$0xff]   ;;  %v427_v5 = vld [vmem:[#allocation6 + $0x18] sm:$0xff]   ;;  %s542_s7 = smov [#allocation9]  }
  0x38   :  { %394 = vmatprep.subr.bf16.mxu1 %v540_v0  ;;  %410 = vmatprep.mubr.msk.bf16.mxu1 %vm541_vm0, %v540_v0  ;;  %v434_v6 = vld [vmem:[#allocation8 + $0x8] sm:$0xff]   ;;  %v428_v7 = vld [vmem:[#allocation6 + $0x20] sm:$0xff]   ;;  %v435_v8 = vld [vmem:[#allocation8 + $0x10] sm:$0xff]   ;;  %s324_s8 = sshll.u32 %s542_s7, 4  ;;  %s325_s8 = int_to_ptr.vmem [resolvable:$true] %s324_s8 }
  0x39   :  { %375 = vmatpush3.bf16.msra.mxu0 %v424_v1  ;;  %395 = vmatpush3.bf16.msra.mxu1 %v433_v4  ;;  %v429_v9 = vld [vmem:[#allocation6 + $0x28] sm:$0xff]   ;;  %v436_v10 = vld [vmem:[#allocation8 + $0x18] sm:$0xff]   ;;  %v430_v11 = vld [vmem:[#allocation6 + $0x30] sm:$0xff]   ;;  %p512_p11 = scmp.lt.s32.totalorder %s325_s8, %s325_s8 }
  0x3a   :  { %376 = vmatprep.subr.bf16.mxu0 %v540_v0  ;;  %396 = vmatprep.subr.bf16.mxu1 %v540_v0  ;;  %v437_v12 = vld [vmem:[#allocation8 + $0x20] sm:$0xff]   ;;  %v431_v13 = vld [vmem:[#allocation6 + $0x38] sm:$0xff]   ;;  %v438_v14 = vld [vmem:[#allocation8 + $0x28] sm:$0xff]  }
  0x3b   :  { %v432_v15 = vld [vmem:[#allocation3] sm:$0xff]   ;;  %v439_v16 = vld [vmem:[#allocation8 + $0x30] sm:$0xff]  }
  0x3c   :  { %v440_v17 = vld [vmem:[#allocation8 + $0x38] sm:$0xff]  }
  0x3d   :  { %377 = vmatpush3.bf16.msra.mxu0 %v425_v2  ;;  %397 = vmatpush3.bf16.msra.mxu1 %v434_v6  ;;  %v337_v18 = vld [vmem:[%s647_s2] ss:$0 sm:$0xff]  ;;  %s507_s2 = scalar_lea.vmem %s325_s8, 256 }
  0x3e   :  { %378 = vmatprep.subr.bf16.mxu0 %v540_v0  ;;  %398 = vmatprep.subr.bf16.mxu1 %v540_v0  ;;  %v355_v28 = vld [vmem:[%s649_s4] ss:$0 sm:$0xff]  ;;  %p508_p10 = scmp.ne.s32.totalorder %s325_s8, %s507_s2  ;;  %p513_p12 = scmp.lt.s32.totalorder %s507_s2, %s507_s2 }
  0x40   :  { %p514_p13 = por %p513_p12, %p512_p11 }
  0x41   :  { %379 = vmatpush3.bf16.msra.mxu0 %v426_v3  ;;  %399 = vmatpush3.bf16.msra.mxu1 %v435_v8 }
  0x42   :  { %380 = vmatprep.subr.bf16.mxu0 %v540_v0  ;;  %400 = vmatprep.subr.bf16.mxu1 %v540_v0  ;;  %p515_p0 = pnand %p514_p13, %p508_p10 }
  0x45   :  { %381 = vmatpush3.bf16.msra.mxu0 %v427_v5  ;;  %401 = vmatpush3.bf16.msra.mxu1 %v436_v10 }
  0x46   :  { %382 = vmatprep.subr.bf16.mxu0 %v540_v0  ;;  %402 = vmatprep.subr.bf16.mxu1 %v540_v0 }
  0x49   :  { %383 = vmatpush3.bf16.msra.mxu0 %v428_v7  ;;  %403 = vmatpush3.bf16.msra.mxu1 %v437_v12 }
  0x4a   :  { %384 = vmatprep.subr.bf16.mxu0 %v540_v0  ;;  %404 = vmatprep.subr.bf16.mxu1 %v540_v0 }
  0x4d   :  { %385 = vmatpush3.bf16.msra.mxu0 %v429_v9  ;;  %405 = vmatpush3.bf16.msra.mxu1 %v438_v14 }
  0x4e   :  { %386 = vmatprep.subr.bf16.mxu0 %v540_v0  ;;  %406 = vmatprep.subr.bf16.mxu1 %v540_v0 }
  0x51   :  { %387 = vmatpush3.bf16.msra.mxu0 %v430_v11  ;;  %407 = vmatpush3.bf16.msra.mxu1 %v439_v16 }
  0x52   :  { %388 = vmatprep.subr.bf16.mxu0 %v540_v0  ;;  %408 = vmatprep.subr.bf16.mxu1 %v540_v0 }
  0x55   :  { %389 = vmatpush3.bf16.msra.mxu0 %v431_v13  ;;  %409 = vmatpush3.bf16.msra.mxu1 %v440_v17 }
  0x58   :  { %391 = vmatmul.mubr.bf16.vlgmr.msra.gmra.mrb[0].mxu0 %v432_v15 }
 0x12b   :  { %v182_v19 = vpop.f32.mrb[0].mxu0 }
 0x12c   :  { %v183_v20 = vadd.f32 %v337_v18, %v182_v19  ;;  %v392_v21 = vpop.f32.mrb[1].mxu0 }
 0x12d   :  { %v185_v22 = vpop.f32.mrb[2].mxu0 }
 0x12e   :  { %v186_v23 = vadd.f32 %v337_v18, %v185_v22  ;;  %v393_v24 = vpop.f32.mrb[3].mxu0  ;;  %v189_v25 = vmax.f32 %v183_v20, 0.0 }
 0x130   :  { %v190_v26 = vmax.f32 %v186_v23, 0.0 }
 0x132   :  { %v193_v27 = vpack.c.bf16 %v190_v26, %v189_v25 }
 0x134   :  { %411 = vmatmul.mubr.bf16.vlgmr.msra.gmra.mrb[0].mxu1 %v193_v27 }
 0x207   :  { %v292_v29 = vpop.f32.mrb[0].mxu1 }
 0x208   :  { %v315_v30 = vadd.f32 %v355_v28, %v292_v29  ;;  %v412_v31 = vpop.f32.mrb[1].mxu1 }
 0x209   :  { %v295_v32 = vpop.f32.mrb[2].mxu1 }
 0x20a   :  { %317 = vst [vmem:[#allocation9] sm:$0xff] %v315_v30  ;;  %v316_v33 = vadd.f32 %v355_v28, %v295_v32  ;;  %v413_v34 = vpop.f32.mrb[3].mxu1 }
 0x20c   :  { %318 = vst [vmem:[#allocation9 + $0x8] sm:$0xff] %v316_v33 }
 0x20d   :  { %518 = shalt.err (!%p515_p0)
}
 0x20e   :  { %s519_s10 = scalar_lea.hbm %s650_s5, 256 }
 0x20f   :  { %p520_p1 = scmp.ne.s32.totalorder %s650_s5, %s519_s10  ;;  %p523_p2 = scmp.lt.u32.totalorder %s519_s10, %s650_s5 }
 0x211   :  { %p525_p3 = pnand %p523_p2, %p520_p1 }
 0x213   :  { %528 = shalt.err (!%p525_p3)
}
 0x214   :  { %s543_s15 = smov 128   ;;  %s544_s16 = smov 8  }
 0x215   :  { %330 = dma.vmem_to_hbm [thread:$0]  %s325_s8, 256, %s650_s5, [#allocation5], %s543_s15, %s543_s15, %s544_s16  }
 0x216   :  { %533 = dma.done.wait [#allocation5], 256  }
 0x217   :  { %534 = vsyncadd [#allocation5], 4294967040 }
 0x218   :  { %334 = vsyncpa [#allocation4], 1 }
 0x219   :  { %335 = vsyncpa [#allocation7], 1 }
 0x21a   :  { %336 = vsyncpa [#allocation5], 1 }

</bundles_post_ra>
